<compile_context>
chip_gen: v5e
topology: v5e:2x2
jax: 0.10.0
libtpu: 0.0.40
codegen_flags: <defaults>
</compile_context>

<pallas_src>
import jax
import jax.numpy as jnp
from jax.experimental import pallas as pl
from jax.experimental.pallas import tpu as pltpu


# ----------------------------- config ---------------------------------------
class Conf:
    USE_IDEAL_M = False
    IDEAL_FUNC = None
    FIX_LV = False
    FIX_LV_CONST = 0.0
    SHARED_COV = False
    out_dim_m = 4
    out_dim_lv = 1
    in_dim = 16
    hidden = 32


def _round_up(n, m):
    return ((n + m - 1) // m) * m


def _pick_tb(B, block_b):
    """Batch tile: as large as block_b allows (amortize per-step overhead),
    but small enough that the grid keeps >= 2 steps when B permits, so the
    "parallel" grid axis can shard across v7x's 2 TensorCores."""
    tb = _round_up(pl.cdiv(B, 2), 8)
    return max(8, min(tb, block_b))


# ----------------------------- kernel ---------------------------------------
def _encdec_kernel(x_ref, wh_ref, bh_ref, wc_ref, bc_ref, o_ref):
    # h = hid_f(x) = tanh(x @ Wh + bh); bias add + tanh in f32 (v5e has no
    # bf16 VPU/EUP), dots accumulate in f32 on the MXU.
    h = jnp.tanh(
        jnp.dot(x_ref[...], wh_ref[...], preferred_element_type=jnp.float32)
        + bh_ref[...]
    )
    # Single fused head matmul over the packed [Wm | Wlv] columns and a single
    # fused output store (mean columns followed by the raw logvar column(s)).
    y = jnp.dot(h.astype(wc_ref.dtype), wc_ref[...],
                preferred_element_type=jnp.float32) + bc_ref[...]
    o_ref[...] = y.astype(o_ref.dtype)


# ----------------------------- parameter packing ----------------------------
def pack_encdec_params(conf, params, *, use_bf16=False):
    """Pack/hoist everything that is per-parameter (not per-call):
    fused head weights [Wm | Wlv], fused biases, SHARED_COV closed-form row,
    and the optional bf16 cast of the matmul operands."""
    wh, bh, wm, bm, wlv, blv = params

    compute_mean = not conf.USE_IDEAL_M
    need_lv = not conf.FIX_LV
    lv_via_matmul = need_lv and not conf.SHARED_COV

    n_mean = conf.out_dim_m if compute_mean else 0
    n_lv = conf.out_dim_lv if lv_via_matmul else 0

    wdt = jnp.bfloat16 if use_bf16 else jnp.float32

    w_parts, b_parts = [], []
    if n_mean:
        w_parts.append(wm)
        b_parts.append(bm)
    if n_lv:
        w_parts.append(wlv)
        b_parts.append(blv)

    packed = {
        "wh": wh.astype(wdt),
        "bh": bh.astype(jnp.float32),
        "wc": None,
        "bc": None,
        "n_mean": n_mean,
        "n_lv": n_lv,
        "lv_row": None,
        "x_dtype": wdt,
    }
    if w_parts:
        packed["wc"] = jnp.concatenate(w_parts, axis=-1).astype(wdt)   # [hidden, n_mean+n_lv]
        packed["bc"] = jnp.concatenate(b_parts, axis=-1).astype(jnp.float32)
    if need_lv and conf.SHARED_COV:
        # lv_f(ones_like(h)) is batch independent: sum(Wlv, 0) + blv.
        packed["lv_row"] = jnp.sum(wlv, axis=0, keepdims=True) + blv   # [1, out_dim_lv]
    return packed


# ----------------------------- wrapper ---------------------------------------
def encdec_forward(conf, packed, x, ind=None, *, block_b=16384,
                   small_batch_threshold=512, force_pallas=False):
    """Reproduces EncDec.forward(x, ind) -> (mean, logvar)."""
    del ind  # unused by these concrete heads
    B = x.shape[0]
    wh, bh = packed["wh"], packed["bh"]
    wc, bc = packed["wc"], packed["bc"]
    n_mean, n_lv = packed["n_mean"], packed["n_lv"]
    in_dim, hidden = wh.shape

    mean = None
    logvar = None

    if conf.USE_IDEAL_M:
        # TODO(synk): IDEAL_FUNC is an arbitrary user callable; evaluated in plain JAX.
        mean = conf.IDEAL_FUNC(x)

    if wc is not None:
        n_out = n_mean + n_lv
        x_in = x.astype(packed["x_dtype"])

        if B < small_batch_threshold and not force_pallas:
            # Micro-batch fallback: launch + BlockSpec machinery costs more
            # than the whole computation; let XLA fuse the two dots + tanh.
            h = jnp.tanh(jnp.dot(x_in, wh, preferred_element_type=jnp.float32) + bh)
            y = jnp.dot(h.astype(wc.dtype), wc,
                        preferred_element_type=jnp.float32) + bc
        else:
            TB = _pick_tb(B, block_b)
            grid = (pl.cdiv(B, TB),)
            # VMEM/step @ TB=16384: x 1 MiB (x2 bufs), h 2 MiB, y+out ~1 MiB,
            # weights negligible -> ~5 MiB, fits the default scoped VMEM on
            # v5e/v6e/v7x with double buffering intact.
            y = pl.pallas_call(
                _encdec_kernel,
                out_shape=jax.ShapeDtypeStruct((B, n_out), jnp.float32),
                grid=grid,
                in_specs=[
                    pl.BlockSpec((TB, in_dim), lambda i: (i, 0)),
                    # weights/biases: constant index_map -> resident in VMEM
                    pl.BlockSpec((in_dim, hidden), lambda i: (0, 0)),
                    pl.BlockSpec((1, hidden), lambda i: (0, 0)),
                    pl.BlockSpec((hidden, n_out), lambda i: (0, 0)),
                    pl.BlockSpec((1, n_out), lambda i: (0, 0)),
                ],
                out_specs=pl.BlockSpec((TB, n_out), lambda i: (i, 0)),
                compiler_params=pltpu.CompilerParams(
                    dimension_semantics=("parallel",)),
            )(x_in, wh, bh, wc, bc)

        if n_mean:
            mean = y[:, :n_mean]
        if n_lv:
            lv_raw = y[:, n_mean:n_mean + n_lv]
            if conf.out_dim_lv == 1:
                # torch.cat(out_dim_m * [logvar], -1): broadcast in the
                # wrapper, so the kernel only writes one raw logvar column.
                logvar = jnp.broadcast_to(lv_raw, (B, conf.out_dim_m))
            else:
                logvar = lv_raw

    if conf.FIX_LV:
        # TODO(synk): PyTorch returns .double(); default JAX has x64 disabled,
        # so this stays float32 unless jax.config.update("jax_enable_x64", True).
        return mean, jnp.zeros((B, conf.out_dim_m), jnp.float32) + conf.FIX_LV_CONST

    if conf.SHARED_COV:
        lv_row = packed["lv_row"]                                   # [1, out_dim_lv]
        logvar = jnp.broadcast_to(lv_row, (B, conf.out_dim_lv))
        if conf.out_dim_lv == 1:
            logvar = jnp.broadcast_to(logvar[:, :1], (B, conf.out_dim_m))

    return mean, logvar


# ----------------------------- reference -------------------------------------
def encdec_reference(conf, params, x):
    wh, bh, wm, bm, wlv, blv = params
    h = jnp.tanh(x @ wh + bh)
    mean = conf.IDEAL_FUNC(x) if conf.USE_IDEAL_M else h @ wm + bm
    if conf.FIX_LV:
        return mean, jnp.zeros((x.shape[0], conf.out_dim_m), jnp.float32) + conf.FIX_LV_CONST
    h_lv = jnp.ones_like(h) if conf.SHARED_COV else h
    logvar = h_lv @ wlv + blv
    if conf.out_dim_lv == 1:
        logvar = jnp.concatenate(conf.out_dim_m * [logvar], axis=-1)
    return mean, logvar


# ----------------------------- main ------------------------------------------
if __name__ == "__main__":
    conf = Conf()

    key = jax.random.PRNGKey(0)
    kx, kx2, k1, k2, k3, k4, k5, k6 = jax.random.split(key, 8)

    wh = jax.random.normal(k1, (conf.in_dim, conf.hidden), jnp.float32) * 0.1
    bh = jax.random.normal(k2, (1, conf.hidden), jnp.float32) * 0.1
    wm = jax.random.normal(k3, (conf.hidden, conf.out_dim_m), jnp.float32) * 0.1
    bm = jax.random.normal(k4, (1, conf.out_dim_m), jnp.float32) * 0.1
    wlv = jax.random.normal(k5, (conf.hidden, conf.out_dim_lv), jnp.float32) * 0.1
    blv = jax.random.normal(k6, (1, conf.out_dim_lv), jnp.float32) * 0.1
    params = (wh, bh, wm, bm, wlv, blv)

    packed = pack_encdec_params(conf, params)
    ind = None  # `ind` unused by this concrete head

    # --- small batch: forced Pallas path (grid=(1,), TB=8) ---
    B = 8
    x = jax.random.normal(kx, (B, conf.in_dim), dtype=jnp.float32)
    mean, logvar = encdec_forward(conf, packed, x, ind, force_pallas=True)
    jax.block_until_ready((mean, logvar))
    mean_ref, logvar_ref = encdec_reference(conf, params, x)
    assert mean.shape == (B, conf.out_dim_m) and logvar.shape == (B, conf.out_dim_m)
    assert jnp.allclose(mean, mean_ref, atol=1e-5, rtol=1e-5)
    assert jnp.allclose(logvar, logvar_ref, atol=1e-5, rtol=1e-5)

    # --- small batch: default path uses the plain-jnp fallback ---
    mean_fb, logvar_fb = encdec_forward(conf, packed, x, ind)
    jax.block_until_ready((mean_fb, logvar_fb))
    assert jnp.allclose(mean_fb, mean_ref, atol=1e-5, rtol=1e-5)
    assert jnp.allclose(logvar_fb, logvar_ref, atol=1e-5, rtol=1e-5)

    # --- large batch (no padding pass; 2-step parallel grid with a masked
    #     partial tail block: B=2005, TB=1008) ---
    B2 = 2005
    x2 = jax.random.normal(kx2, (B2, conf.in_dim), dtype=jnp.float32)
    mean2, logvar2 = encdec_forward(conf, packed, x2, ind)
    jax.block_until_ready((mean2, logvar2))
    mean2_ref, logvar2_ref = encdec_reference(conf, params, x2)
    assert mean2.shape == (B2, conf.out_dim_m) and logvar2.shape == (B2, conf.out_dim_m)
    assert jnp.allclose(mean2, mean2_ref, atol=1e-5, rtol=1e-5)
    assert jnp.allclose(logvar2, logvar2_ref, atol=1e-5, rtol=1e-5)

    # --- SHARED_COV config (logvar has no matmul; kernel only computes mean) ---
    class ConfShared(Conf):
        SHARED_COV = True

    conf_sc = ConfShared()
    packed_sc = pack_encdec_params(conf_sc, params)
    mean3, logvar3 = encdec_forward(conf_sc, packed_sc, x2, ind)
    jax.block_until_ready((mean3, logvar3))
    mean3_ref, logvar3_ref = encdec_reference(conf_sc, params, x2)
    assert jnp.allclose(mean3, mean3_ref, atol=1e-5, rtol=1e-5)
    assert jnp.allclose(logvar3, logvar3_ref, atol=1e-5, rtol=1e-5)

    # --- FIX_LV config (logvar is a constant; only the mean head runs) ---
    class ConfFix(Conf):
        FIX_LV = True
        FIX_LV_CONST = -1.5

    conf_fx = ConfFix()
    packed_fx = pack_encdec_params(conf_fx, params)
    mean4, logvar4 = encdec_forward(conf_fx, packed_fx, x, ind)
    jax.block_until_ready((mean4, logvar4))
    mean4_ref, logvar4_ref = encdec_reference(conf_fx, params, x)
    assert jnp.allclose(mean4, mean4_ref, atol=1e-5, rtol=1e-5)
    assert jnp.allclose(logvar4, logvar4_ref, atol=1e-5, rtol=1e-5)

    # --- optional bf16 matmul operands (accuracy-gated; loose tolerance) ---
    packed_bf = pack_encdec_params(conf, params, use_bf16=True)
    mean5, logvar5 = encdec_forward(conf, packed_bf, x2, ind)
    jax.block_until_ready((mean5, logvar5))
    assert jnp.allclose(mean5, mean2_ref, atol=5e-2, rtol=5e-2)
    assert jnp.allclose(logvar5, logvar2_ref, atol=5e-2, rtol=5e-2)

    print("KERNEL_OK")
</pallas_src>

<mosaic_0001>
module attributes {stable_mosaic.version = 11 : i64} {
  func.func @_encdec_kernel(%arg0: i32, %arg1: memref<8x16xf32, #tpu.memory_space<vmem>>, %arg2: memref<16x32xf32, #tpu.memory_space<vmem>>, %arg3: memref<1x32xf32, #tpu.memory_space<vmem>>, %arg4: memref<32x5xf32, #tpu.memory_space<vmem>>, %arg5: memref<1x5xf32, #tpu.memory_space<vmem>>, %arg6: memref<8x5xf32, #tpu.memory_space<vmem>>) attributes {dimension_semantics = [#tpu.dimension_semantics<parallel>], iteration_bounds = array<i64: 1>, scalar_prefetch = 0 : i64, scratch_operands = 0 : i64, tpu.core_type = #tpu.core_type<tc>, window_params = [{transform_indices = @transform_0, window_bounds = array<i64: 8, 16>}, {pipeline_mode = #tpu.pipeline_mode<synchronous>, transform_indices = @transform_1, window_bounds = array<i64: 16, 32>}, {pipeline_mode = #tpu.pipeline_mode<synchronous>, transform_indices = @transform_2, window_bounds = array<i64: 1, 32>}, {pipeline_mode = #tpu.pipeline_mode<synchronous>, transform_indices = @transform_3, window_bounds = array<i64: 32, 5>}, {pipeline_mode = #tpu.pipeline_mode<synchronous>, transform_indices = @transform_4, window_bounds = array<i64: 1, 5>}, {transform_indices = @transform_5, window_bounds = array<i64: 8, 5>}]} {
    %c0 = arith.constant 0 : index
    %c0_0 = arith.constant 0 : index
    %0 = vector.load %arg1[%c0, %c0_0] : memref<8x16xf32, #tpu.memory_space<vmem>>, vector<8x16xf32>
    %c0_1 = arith.constant 0 : index
    %c0_2 = arith.constant 0 : index
    %1 = vector.load %arg2[%c0_1, %c0_2] : memref<16x32xf32, #tpu.memory_space<vmem>>, vector<16x32xf32>
    %cst = arith.constant dense<0.000000e+00> : vector<8x32xf32>
    %2 = tpu.matmul %0, %1, %cst {dimension_numbers = #tpu.dot_dimension_numbers<[1], [0], [0], [1], [0, 0, 1, 1], [], []>} : vector<8x16xf32>, vector<16x32xf32>, vector<8x32xf32> -> vector<8x32xf32>
    %c0_3 = arith.constant 0 : index
    %c0_4 = arith.constant 0 : index
    %3 = vector.load %arg3[%c0_3, %c0_4] : memref<1x32xf32, #tpu.memory_space<vmem>>, vector<1x32xf32>
    %4 = vector.broadcast %3 : vector<1x32xf32> to vector<8x32xf32>
    %5 = arith.addf %2, %4 : vector<8x32xf32>
    %6 = math.tanh %5 : vector<8x32xf32>
    %c0_5 = arith.constant 0 : index
    %c0_6 = arith.constant 0 : index
    %7 = vector.load %arg4[%c0_5, %c0_6] : memref<32x5xf32, #tpu.memory_space<vmem>>, vector<32x5xf32>
    %cst_7 = arith.constant dense<0.000000e+00> : vector<8x5xf32>
    %8 = tpu.matmul %6, %7, %cst_7 {dimension_numbers = #tpu.dot_dimension_numbers<[1], [0], [0], [1], [0, 0, 1, 1], [], []>} : vector<8x32xf32>, vector<32x5xf32>, vector<8x5xf32> -> vector<8x5xf32>
    %c0_8 = arith.constant 0 : index
    %c0_9 = arith.constant 0 : index
    %9 = vector.load %arg5[%c0_8, %c0_9] : memref<1x5xf32, #tpu.memory_space<vmem>>, vector<1x5xf32>
    %10 = vector.broadcast %9 : vector<1x5xf32> to vector<8x5xf32>
    %11 = arith.addf %8, %10 : vector<8x5xf32>
    %c0_10 = arith.constant 0 : index
    %c0_11 = arith.constant 0 : index
    %12 = vector.load %arg6[%c0_10, %c0_11] : memref<8x5xf32, #tpu.memory_space<vmem>>, vector<8x5xf32>
    tpu.vector_store %arg6[%c0_10, %c0_11], %11 {strides = array<i32>} : memref<8x5xf32, #tpu.memory_space<vmem>>, vector<8x5xf32>,
    return
  }
  func.func @transform_0(%arg0: i32) -> (i32, i32) {
    %c0_i32 = arith.constant 0 : i32
    %c0_i32_0 = arith.constant 0 : i32
    return %arg0, %c0_i32 : i32, i32
  }
  func.func @transform_1(%arg0: i32) -> (i32, i32) {
    %c0_i32 = arith.constant 0 : i32
    %c0_i32_0 = arith.constant 0 : i32
    %c0_i32_1 = arith.constant 0 : i32
    return %c0_i32, %c0_i32_0 : i32, i32
  }
  func.func @transform_2(%arg0: i32) -> (i32, i32) {
    %c0_i32 = arith.constant 0 : i32
    %c0_i32_0 = arith.constant 0 : i32
    %c0_i32_1 = arith.constant 0 : i32
    return %c0_i32, %c0_i32_0 : i32, i32
  }
  func.func @transform_3(%arg0: i32) -> (i32, i32) {
    %c0_i32 = arith.constant 0 : i32
    %c0_i32_0 = arith.constant 0 : i32
    %c0_i32_1 = arith.constant 0 : i32
    return %c0_i32, %c0_i32_0 : i32, i32
  }
  func.func @transform_4(%arg0: i32) -> (i32, i32) {
    %c0_i32 = arith.constant 0 : i32
    %c0_i32_0 = arith.constant 0 : i32
    %c0_i32_1 = arith.constant 0 : i32
    return %c0_i32, %c0_i32_0 : i32, i32
  }
  func.func @transform_5(%arg0: i32) -> (i32, i32) {
    %c0_i32 = arith.constant 0 : i32
    %c0_i32_0 = arith.constant 0 : i32
    return %arg0, %c0_i32 : i32, i32
  }
}

</mosaic_0001>

<bundles_post_ra>
// kernel: tpu_custom_call.1
= control target key start
LH: loop header
LB: loop body
LE: loop exit
PB: predicated region body
PF: predicated region fallthrough
CT: control target
= control target key end

     0   :  { %vm28_vm0 = vcmask 130048   ;;  %s197_s0 = inlined_call_operand.vmem [shape: f32[8,16], index: 0, kind: input, shape index: {}]   ;;  %s198_s1 = inlined_call_operand.vmem [shape: f32[16,32], index: 1, kind: input, shape index: {}]   ;;  %s199_s2 = inlined_call_operand.vmem [shape: f32[1,32], index: 2, kind: input, shape index: {}]   ;;  %s200_s3 = inlined_call_operand.vmem [shape: f32[32,5], index: 3, kind: input, shape index: {}]   ;;  %s201_s4 = inlined_call_operand.vmem [shape: f32[1,5], index: 4, kind: input, shape index: {}]   ;;  %s202_s5 = inlined_call_operand.hbm [shape: f32[8,5], index: 5, kind: output, shape index: {}]  }
   0x1   :  { %v23_v0 = vld [vmem:[%s198_s1 + $0x8] sm:$0xff]  ;;  %v22_v1 = vld [vmem:[%s198_s1] sm:$0xff] }
   0x2   :  { %46 = vmatpush.msra.mxu0 %v23_v0  ;;  %v21_v2 = vld [vmem:[%s197_s0] sm:$0xff] }
   0x3   :  { %10 = vsyncpa [#allocation3], 0  ;;  %v56_v3 = vld [vmem:[%s200_s3 + $0x18] sm:$0xff]  ;;  %v55_v4 = vld [vmem:[%s200_s3 + $0x10] sm:$0xff]  ;;  %vm61_vm1 = vcmask 261120   ;;  %s136_s9 = smov [#allocation2]  }
   0x4   :  { %47 = vmatpush.msra.mxu0 %v22_v1  ;;  %77 = vmatpush.msra.mxu1 %v56_v3  ;;  %v54_v5 = vld [vmem:[%s200_s3 + $0x8] sm:$0xff]  ;;  %v53_v6 = vld [vmem:[%s200_s3] sm:$0xff]  ;;  %s92_s10 = sshll.u32 %s136_s9, 4  ;;  %s94_s12 = sshll.u32 %s202_s5, 4  ;;  %vm85_vm2 = vcmask 39936   ;;  %s93_s10 = int_to_ptr.vmem [resolvable:$true] %s92_s10  ;;  %s95_s12 = int_to_ptr.hbm [resolvable:$true] %s94_s12 }
   0x5   :  { %103 = vmatmul.msk.f32.vlgmr.msra.gmra.mxu0 %vm28_vm0, %v21_v2  ;;  %v106_v7 = vld [vmem:[%s199_s2] ss:$0 sm:$0xff] }
   0x6   :  { %78 = vmatpush.msra.mxu1 %v55_v4  ;;  %v107_v11 = vld [vmem:[%s201_s4] ss:$0 sm:$0xff] }
   0x8   :  { %79 = vmatpush.msra.mxu1 %v54_v5 }
   0xa   :  { %80 = vmatpush.msra.mxu1 %v53_v6 }
  0x82   :  { %v49_v8 = vpop.f32.mrf.mxu0 }
  0x83   :  { %v50_v9 = vadd.f32 %v106_v7, %v49_v8 }
  0x85   :  { %108 = vtanh.f32 %v50_v9 }
  0x8b   :  { %v109_v10 = vpop.eup %108 }
  0x8c   :  { %104 = vmatmul.msk.f32.vlgmr.msra.gmra.mxu1 %vm61_vm1, %v109_v10 }
 0x109   :  { %v82_v12 = vpop.f32.mrf.mxu1 }
 0x10a   :  { %v83_v13 = vadd.f32 %v107_v11, %v82_v12 }
 0x10c   :  { %86 = vst.msk [vmem:[#allocation2] sm:$0xff] %vm85_vm2, %v83_v13 }
 0x10d   :  { %97 = dma.vmem_to_hbm [thread:$0]  %s93_s10, 128, %s95_s12, [#allocation3]  }
 0x10e   :  { %134 = dma.done.wait [#allocation3], 128  }
 0x10f   :  { %135 = vsyncadd [#allocation3], 4294967168 }
 0x110   :  { %102 = vsyncpa [#allocation3], 1 }

</bundles_post_ra>
